<compile_context>
chip_gen: v7x
topology: tpu7x:2x2x1
jax: 0.10.0
libtpu: 0.0.40
codegen_flags: <defaults>
</compile_context>

<pallas_src>
import jax
import jax.numpy as jnp
from jax import lax
from jax.experimental import pallas as pl
from jax.experimental.pallas import tpu as pltpu

EPS = 1e-07
_NEG_PAD = -1e30  # bias value for padded feature columns -> excluded from softmax


def _round_up(x, m):
    return (x + m - 1) // m * m


def _one_hot(b_col, nbp):
    """(rows, 1) int32 batch ids -> (rows, nbp) f32 one-hot matrix."""
    ids = lax.broadcasted_iota(jnp.int32, (b_col.shape[0], nbp), 1)
    return (ids == b_col).astype(jnp.float32)


def _gather(onehot, tbl_ref, k):
    """Row-gather table k of the stacked (3, NBp, F) tables via MXU one-hot dot."""
    return jnp.dot(onehot, tbl_ref[k],
                   preferred_element_type=jnp.float32,
                   precision=lax.Precision.HIGHEST)


# --------------------------------------------------------------------------
# Path A: full feature axis resident in VMEM (single pass).
# --------------------------------------------------------------------------
def _zinb_resident_kernel(b_ref, u_ref, vT_ref, tbl_ref, l_ref, out_ref):
    onehot = _one_hot(b_ref[...], tbl_ref.shape[1])
    uv = jnp.dot(u_ref[...], vT_ref[...], preferred_element_type=jnp.float32)
    # consume uv / scale / bias immediately (short live ranges)
    s = _gather(onehot, tbl_ref, 0) * uv + _gather(onehot, tbl_ref, 1)
    m = jnp.max(s, axis=1, keepdims=True)
    e = jnp.exp(s - m)
    denom = jnp.sum(e, axis=1, keepdims=True)
    #   mu = softmax(s) * l ;  log(mu + EPS) = log(e*l + EPS*denom) - log(denom)
    out_ref[...] = (jnp.log(e * l_ref[...] + EPS * denom) - jnp.log(denom)
                    - _gather(onehot, tbl_ref, 2)).astype(out_ref.dtype)


# --------------------------------------------------------------------------
# Path B: feature-blocked two-pass (for large F / small VMEM, e.g. v7x).
# Pass 1: online row max + softmax denominator accumulated in (tile,1) outputs.
# --------------------------------------------------------------------------
def _zinb_md_kernel(b_ref, u_ref, vT_ref, tbl_ref, m_ref, d_ref):
    @pl.when(pl.program_id(1) == 0)
    def _():
        m_ref[...] = jnp.full_like(m_ref, _NEG_PAD)
        d_ref[...] = jnp.zeros_like(d_ref)

    onehot = _one_hot(b_ref[...], tbl_ref.shape[1])
    uv = jnp.dot(u_ref[...], vT_ref[...], preferred_element_type=jnp.float32)
    s = _gather(onehot, tbl_ref, 0) * uv + _gather(onehot, tbl_ref, 1)
    m_old = m_ref[...]
    m_new = jnp.maximum(m_old, jnp.max(s, axis=1, keepdims=True))
    d_ref[...] = (d_ref[...] * jnp.exp(m_old - m_new)
                  + jnp.sum(jnp.exp(s - m_new), axis=1, keepdims=True))
    m_ref[...] = m_new


# Pass 2: recompute the block logits and emit the ZINB nb_logits block.
def _zinb_out_kernel(b_ref, u_ref, vT_ref, tbl_ref, l_ref, m_ref, d_ref,
                     out_ref):
    onehot = _one_hot(b_ref[...], tbl_ref.shape[1])
    uv = jnp.dot(u_ref[...], vT_ref[...], preferred_element_type=jnp.float32)
    s = _gather(onehot, tbl_ref, 0) * uv + _gather(onehot, tbl_ref, 1)
    e = jnp.exp(s - m_ref[...])
    d = d_ref[...]
    out_ref[...] = (jnp.log(e * l_ref[...] + EPS * d) - jnp.log(d)
                    - _gather(onehot, tbl_ref, 2)).astype(out_ref.dtype)


# --------------------------------------------------------------------------
# Wrapper
# --------------------------------------------------------------------------
def zinb_decoder_forward(u, v, b, l, params, *, tn=256, feature_block=None,
                         matmul_dtype=jnp.float32, out_dtype=jnp.float32):
    """Returns (zi_logits, total_count, nb_logits), each (N, F)."""
    N, D = u.shape
    F_ = v.shape[0]
    NB = params["scale_lin"].shape[0]
    NBp = max(_round_up(NB, 8), 8)

    msize = jnp.dtype(matmul_dtype).itemsize
    osize = jnp.dtype(out_dtype).itemsize

    # Row tile: sublane aligned, and >= 2 grid steps when possible so the
    # "parallel" row axis can engage both v7x TensorCores.
    tile = min(_round_up(tn, 8), _round_up(N, 8))
    if N >= 16:
        tile = min(tile, _round_up((N + 1) // 2, 8))
    Np = _round_up(N, tile)
    pad_n = Np - N

    # Per-core VMEM capacity; fall back to the smallest generation (v7x, 64MiB).
    try:
        vmem_cap = int(pltpu.get_tpu_info().vmem_capacity_bytes)
    except Exception:
        vmem_cap = 64 << 20
    vmem_budget = int(0.75 * vmem_cap)

    def est_vmem(fp):
        # double-buffered I/O streams + resident tables + live f32 temporaries
        return (2 * tile * (D * msize + 12)        # u, b, l
                + 2 * D * fp * msize               # vT
                + 2 * 3 * NBp * fp * 4             # stacked parameter tables
                + 2 * tile * fp * osize            # output
                + 5 * tile * fp * 4)               # in-kernel f32 temporaries

    Fp_full = _round_up(max(F_, 128), 128)
    if feature_block is not None:
        tf = _round_up(min(max(feature_block, 128), Fp_full), 128)
        blocked = tf < Fp_full
    elif est_vmem(Fp_full) <= vmem_budget:
        blocked = False
    else:
        tf = Fp_full
        while tf > 128 and est_vmem(tf) > vmem_budget:
            tf = _round_up(tf // 2, 128)
        blocked = True

    Fp = _round_up(F_, tf) if blocked else Fp_full
    pad_f = Fp - F_
    vmem_limit = int(min(max(2 * est_vmem(tf if blocked else Fp), 8 << 20),
                         vmem_budget))

    # Softplus hoisted out of the kernel onto the tiny (NB, F) table; tables
    # stacked into one (3, NBp, Fp) f32 stream (padded batch rows are never
    # selected by the one-hot gather, padded feature cols are sliced off /
    # killed by the -1e30 bias).
    def pad_tbl(t, cv=0.0):
        return jnp.pad(t.astype(jnp.float32), ((0, NBp - NB), (0, pad_f)),
                       constant_values=cv)
    tbl = jnp.stack([pad_tbl(jax.nn.softplus(params["scale_lin"])),
                     pad_tbl(params["bias"], _NEG_PAD),
                     pad_tbl(params["log_theta"])], axis=0)

    vT = jnp.pad(v.T.astype(matmul_dtype), ((0, 0), (0, pad_f)))
    u_p = jnp.pad(u.astype(matmul_dtype), ((0, pad_n), (0, 0)))
    b_p = jnp.pad(b.astype(jnp.int32), ((0, pad_n),)).reshape(Np, 1)
    l_p = jnp.pad(jnp.asarray(l, jnp.float32).reshape(N, 1),
                  ((0, pad_n), (0, 0)), constant_values=1.0)

    if not blocked:
        grid = (Np // tile,)
        nb_logits_p = pl.pallas_call(
            _zinb_resident_kernel,
            out_shape=jax.ShapeDtypeStruct((Np, Fp), out_dtype),
            grid_spec=pltpu.PrefetchScalarGridSpec(
                num_scalar_prefetch=0, grid=grid,
                in_specs=[pl.BlockSpec((tile, 1), lambda i: (i, 0)),
                          pl.BlockSpec((tile, D), lambda i: (i, 0)),
                          pl.BlockSpec((D, Fp), lambda i: (0, 0)),
                          pl.BlockSpec((3, NBp, Fp), lambda i: (0, 0, 0)),
                          pl.BlockSpec((tile, 1), lambda i: (i, 0))],
                out_specs=pl.BlockSpec((tile, Fp), lambda i: (i, 0))),
            compiler_params=pltpu.CompilerParams(
                dimension_semantics=("parallel",),
                vmem_limit_bytes=vmem_limit),
        )(b_p, u_p, vT, tbl, l_p)
    else:
        n_fb = Fp // tf
        grid2 = (Np // tile, n_fb)
        b_spec = pl.BlockSpec((tile, 1), lambda i, j: (i, 0))
        u_spec = pl.BlockSpec((tile, D), lambda i, j: (i, 0))
        l_spec = pl.BlockSpec((tile, 1), lambda i, j: (i, 0))
        vT_spec = pl.BlockSpec((D, tf), lambda i, j: (0, j))
        tbl_spec = pl.BlockSpec((3, NBp, tf), lambda i, j: (0, 0, j))
        md_spec = pl.BlockSpec((tile, 1), lambda i, j: (i, 0))
        out_spec = pl.BlockSpec((tile, tf), lambda i, j: (i, j))

        # Pass 1: per-row max + softmax denominator (feature axis is a
        # reduction -> "arbitrary", (tile,1) outputs stay resident across it).
        m_p, d_p = pl.pallas_call(
            _zinb_md_kernel,
            out_shape=(jax.ShapeDtypeStruct((Np, 1), jnp.float32),
                       jax.ShapeDtypeStruct((Np, 1), jnp.float32)),
            grid_spec=pltpu.PrefetchScalarGridSpec(
                num_scalar_prefetch=0, grid=grid2,
                in_specs=[b_spec, u_spec, vT_spec, tbl_spec],
                out_specs=(md_spec, md_spec)),
            compiler_params=pltpu.CompilerParams(
                dimension_semantics=("parallel", "arbitrary"),
                vmem_limit_bytes=vmem_limit),
        )(b_p, u_p, vT, tbl)

        # Pass 2: embarrassingly parallel writeback of each feature block.
        nb_logits_p = pl.pallas_call(
            _zinb_out_kernel,
            out_shape=jax.ShapeDtypeStruct((Np, Fp), out_dtype),
            grid_spec=pltpu.PrefetchScalarGridSpec(
                num_scalar_prefetch=0, grid=grid2,
                in_specs=[b_spec, u_spec, vT_spec, tbl_spec, l_spec,
                          md_spec, md_spec],
                out_specs=out_spec),
            compiler_params=pltpu.CompilerParams(
                dimension_semantics=("parallel", "parallel"),
                vmem_limit_bytes=vmem_limit),
        )(b_p, u_p, vT, tbl, l_p, m_p, d_p)

    nb_logits = nb_logits_p[:N, :F_]

    # Cheap (NB,F) -> (N,F) lookups stay in XLA (no extra kernel HBM streams):
    zi_logits = params["zi_logits"][b]
    total_count = jnp.exp(params["log_theta"])[b]
    return zi_logits, total_count, nb_logits


def init_params(key, n_features, n_batches):
    # xavier_uniform_ on an (n_batches, n_features) tensor.
    bound = (6.0 / (n_batches + n_features)) ** 0.5
    k1, k2, k3 = jax.random.split(key, 3)
    return {
        "scale_lin": jax.random.uniform(k1, (n_batches, n_features),
                                        jnp.float32, -bound, bound),
        "bias": jax.random.uniform(k2, (n_batches, n_features),
                                   jnp.float32, -bound, bound),
        "log_theta": jax.random.uniform(k3, (n_batches, n_features),
                                        jnp.float32, -bound, bound),
        "zi_logits": jnp.zeros((n_batches, n_features), jnp.float32),
    }


def reference_forward(u, v, b, l, params):
    scale = jax.nn.softplus(params["scale_lin"][b])
    logit_mu = scale * (u @ v.T) + params["bias"][b]
    mu = jax.nn.softmax(logit_mu, axis=1) * l
    log_theta = params["log_theta"][b]
    zi = params["zi_logits"][b]
    return zi, jnp.exp(log_theta), jnp.log(mu + EPS) - log_theta


if __name__ == "__main__":
    key = jax.random.PRNGKey(0)
    # cells, latent dim, features (non-multiple of 128 to exercise padding), batches
    N, D, F_, NB = 48, 32, 200, 3

    kp, ku, kv, kb, kl = jax.random.split(key, 5)
    params = init_params(kp, F_, NB)
    u = jax.random.normal(ku, (N, D), jnp.float32)
    v = jax.random.normal(kv, (F_, D), jnp.float32)
    b = jax.random.randint(kb, (N,), 0, NB)
    l = jnp.exp(jax.random.normal(kl, (N, 1), jnp.float32)) * 100.0  # library size

    zi_r, theta_r, logits_r = reference_forward(u, v, b, l, params)

    # 1) resident single-pass path, f32 end to end (strict check).
    zi, theta, logits = zinb_decoder_forward(u, v, b, l, params, tn=16)
    jax.block_until_ready((zi, theta, logits))
    assert zi.shape == (N, F_) and theta.shape == (N, F_) and logits.shape == (N, F_)
    assert jnp.allclose(zi, zi_r, atol=1e-5, rtol=1e-5)
    assert jnp.allclose(theta, theta_r, atol=1e-5, rtol=1e-5)
    assert jnp.allclose(logits, logits_r, atol=1e-4, rtol=1e-4)

    # 2) feature-blocked two-pass path (forced small feature block), strict check.
    _, _, logits_blk = zinb_decoder_forward(u, v, b, l, params, tn=16,
                                            feature_block=128)
    jax.block_until_ready(logits_blk)
    assert logits_blk.shape == (N, F_)
    assert jnp.allclose(logits_blk, logits_r, atol=1e-4, rtol=1e-4)

    # 3) bf16 matmul operands + bf16 output stream (v6e/v7x fast path); loose check.
    _, _, logits_fast = zinb_decoder_forward(u, v, b, l, params, tn=256,
                                             matmul_dtype=jnp.bfloat16,
                                             out_dtype=jnp.bfloat16)
    jax.block_until_ready(logits_fast)
    assert logits_fast.shape == (N, F_)
    lf = logits_fast.astype(jnp.float32)
    assert bool(jnp.all(jnp.isfinite(lf)))
    assert float(jnp.max(jnp.abs(lf - logits_r))) < 0.5

    print("KERNEL_OK")
</pallas_src>

<mosaic_0001>
module attributes {stable_mosaic.version = 11 : i64} {
  func.func @_zinb_resident_kernel(%arg0: i32, %arg1: memref<16x1xi32, #tpu.memory_space<vmem>>, %arg2: memref<16x32xf32, #tpu.memory_space<vmem>>, %arg3: memref<32x256xf32, #tpu.memory_space<vmem>>, %arg4: memref<3x8x256xf32, #tpu.memory_space<vmem>>, %arg5: memref<16x1xf32, #tpu.memory_space<vmem>>, %arg6: memref<16x256xf32, #tpu.memory_space<vmem>>) attributes {dimension_semantics = [#tpu.dimension_semantics<parallel>], iteration_bounds = array<i64: 3>, scalar_prefetch = 0 : i64, scratch_operands = 0 : i64, tpu.core_type = #tpu.core_type<tc>, window_params = [{transform_indices = @transform_0, window_bounds = array<i64: 16, 1>}, {transform_indices = @transform_1, window_bounds = array<i64: 16, 32>}, {pipeline_mode = #tpu.pipeline_mode<synchronous>, transform_indices = @transform_2, window_bounds = array<i64: 32, 256>}, {pipeline_mode = #tpu.pipeline_mode<synchronous>, transform_indices = @transform_3, window_bounds = array<i64: 3, 8, 256>}, {transform_indices = @transform_4, window_bounds = array<i64: 16, 1>}, {transform_indices = @transform_5, window_bounds = array<i64: 16, 256>}]} {
    %c0 = arith.constant 0 : index
    %c0_0 = arith.constant 0 : index
    %0 = vector.load %arg1[%c0, %c0_0] : memref<16x1xi32, #tpu.memory_space<vmem>>, vector<16x1xi32>
    %1 = tpu.iota {dimensions = array<i32: 1>} : vector<16x8xi32>
    %2 = vector.broadcast %0 : vector<16x1xi32> to vector<16x8xi32>
    %3 = arith.cmpi eq, %1, %2 : vector<16x8xi32>
    %4 = arith.extui %3 : vector<16x8xi1> to vector<16x8xi32>
    %5 = arith.sitofp %4 : vector<16x8xi32> to vector<16x8xf32>
    %c0_1 = arith.constant 0 : index
    %c0_2 = arith.constant 0 : index
    %6 = vector.load %arg2[%c0_1, %c0_2] : memref<16x32xf32, #tpu.memory_space<vmem>>, vector<16x32xf32>
    %c0_3 = arith.constant 0 : index
    %c0_4 = arith.constant 0 : index
    %7 = vector.load %arg3[%c0_3, %c0_4] : memref<32x256xf32, #tpu.memory_space<vmem>>, vector<32x256xf32>
    %cst = arith.constant dense<0.000000e+00> : vector<16x256xf32>
    %8 = tpu.matmul %6, %7, %cst {dimension_numbers = #tpu.dot_dimension_numbers<[1], [0], [0], [1], [0, 0, 1, 1], [], []>} : vector<16x32xf32>, vector<32x256xf32>, vector<16x256xf32> -> vector<16x256xf32>
    %c0_5 = arith.constant 0 : index
    %c0_6 = arith.constant 0 : index
    %c0_7 = arith.constant 0 : index
    %9 = vector.load %arg4[%c0_5, %c0_6, %c0_7] : memref<3x8x256xf32, #tpu.memory_space<vmem>>, vector<1x8x256xf32>
    %10 = vector.shape_cast %9 : vector<1x8x256xf32> to vector<8x256xf32>
    %cst_8 = arith.constant dense<0.000000e+00> : vector<16x256xf32>
    %11 = tpu.matmul %5, %10, %cst_8 {dimension_numbers = #tpu.dot_dimension_numbers<[1], [0], [0], [1], [0, 0, 1, 1], [], []>, precision = #tpu.contract_precision<fp32>} : vector<16x8xf32>, vector<8x256xf32>, vector<16x256xf32> -> vector<16x256xf32>
    %12 = arith.mulf %11, %8 : vector<16x256xf32>
    %c1 = arith.constant 1 : index
    %c0_9 = arith.constant 0 : index
    %c0_10 = arith.constant 0 : index
    %13 = vector.load %arg4[%c1, %c0_9, %c0_10] : memref<3x8x256xf32, #tpu.memory_space<vmem>>, vector<1x8x256xf32>
    %14 = vector.shape_cast %13 : vector<1x8x256xf32> to vector<8x256xf32>
    %cst_11 = arith.constant dense<0.000000e+00> : vector<16x256xf32>
    %15 = tpu.matmul %5, %14, %cst_11 {dimension_numbers = #tpu.dot_dimension_numbers<[1], [0], [0], [1], [0, 0, 1, 1], [], []>, precision = #tpu.contract_precision<fp32>} : vector<16x8xf32>, vector<8x256xf32>, vector<16x256xf32> -> vector<16x256xf32>
    %16 = arith.addf %12, %15 : vector<16x256xf32>
    %cst_12 = arith.constant dense<0xFF800000> : vector<16xf32>
    %17 = vector.multi_reduction <maximumf>, %16, %cst_12 [1] : vector<16x256xf32> to vector<16xf32>
    %18 = vector.shape_cast %17 : vector<16xf32> to vector<16x1xf32>
    %19 = vector.broadcast %18 : vector<16x1xf32> to vector<16x256xf32>
    %20 = arith.subf %16, %19 : vector<16x256xf32>
    %21 = math.exp %20 : vector<16x256xf32>
    %cst_13 = arith.constant dense<0.000000e+00> : vector<16xf32>
    %22 = vector.multi_reduction <add>, %21, %cst_13 [1] : vector<16x256xf32> to vector<16xf32>
    %23 = vector.shape_cast %22 : vector<16xf32> to vector<16x1xf32>
    %c0_14 = arith.constant 0 : index
    %c0_15 = arith.constant 0 : index
    %24 = vector.load %arg5[%c0_14, %c0_15] : memref<16x1xf32, #tpu.memory_space<vmem>>, vector<16x1xf32>
    %25 = vector.broadcast %24 : vector<16x1xf32> to vector<16x256xf32>
    %26 = arith.mulf %21, %25 : vector<16x256xf32>
    %cst_16 = arith.constant 1.000000e-07 : f32
    %27 = vector.broadcast %cst_16 : f32 to vector<16x1xf32>
    %28 = arith.mulf %27, %23 : vector<16x1xf32>
    %29 = vector.broadcast %28 : vector<16x1xf32> to vector<16x256xf32>
    %30 = arith.addf %26, %29 : vector<16x256xf32>
    %31 = math.log %30 : vector<16x256xf32>
    %32 = math.log %23 : vector<16x1xf32>
    %33 = vector.broadcast %32 : vector<16x1xf32> to vector<16x256xf32>
    %34 = arith.subf %31, %33 : vector<16x256xf32>
    %c2 = arith.constant 2 : index
    %c0_17 = arith.constant 0 : index
    %c0_18 = arith.constant 0 : index
    %35 = vector.load %arg4[%c2, %c0_17, %c0_18] : memref<3x8x256xf32, #tpu.memory_space<vmem>>, vector<1x8x256xf32>
    %36 = vector.shape_cast %35 : vector<1x8x256xf32> to vector<8x256xf32>
    %cst_19 = arith.constant dense<0.000000e+00> : vector<16x256xf32>
    %37 = tpu.matmul %5, %36, %cst_19 {dimension_numbers = #tpu.dot_dimension_numbers<[1], [0], [0], [1], [0, 0, 1, 1], [], []>, precision = #tpu.contract_precision<fp32>} : vector<16x8xf32>, vector<8x256xf32>, vector<16x256xf32> -> vector<16x256xf32>
    %38 = arith.subf %34, %37 : vector<16x256xf32>
    %c0_20 = arith.constant 0 : index
    %c0_21 = arith.constant 0 : index
    %39 = vector.load %arg6[%c0_20, %c0_21] : memref<16x256xf32, #tpu.memory_space<vmem>>, vector<16x256xf32>
    tpu.vector_store %arg6[%c0_20, %c0_21], %38 {strides = array<i32>} : memref<16x256xf32, #tpu.memory_space<vmem>>, vector<16x256xf32>,
    return
  }
  func.func @transform_0(%arg0: i32) -> (i32, i32) {
    %c0_i32 = arith.constant 0 : i32
    %c0_i32_0 = arith.constant 0 : i32
    return %arg0, %c0_i32 : i32, i32
  }
  func.func @transform_1(%arg0: i32) -> (i32, i32) {
    %c0_i32 = arith.constant 0 : i32
    %c0_i32_0 = arith.constant 0 : i32
    return %arg0, %c0_i32 : i32, i32
  }
  func.func @transform_2(%arg0: i32) -> (i32, i32) {
    %c0_i32 = arith.constant 0 : i32
    %c0_i32_0 = arith.constant 0 : i32
    %c0_i32_1 = arith.constant 0 : i32
    return %c0_i32, %c0_i32_0 : i32, i32
  }
  func.func @transform_3(%arg0: i32) -> (i32, i32, i32) {
    %c0_i32 = arith.constant 0 : i32
    %c0_i32_0 = arith.constant 0 : i32
    %c0_i32_1 = arith.constant 0 : i32
    %c0_i32_2 = arith.constant 0 : i32
    return %c0_i32, %c0_i32_0, %c0_i32_1 : i32, i32, i32
  }
  func.func @transform_4(%arg0: i32) -> (i32, i32) {
    %c0_i32 = arith.constant 0 : i32
    %c0_i32_0 = arith.constant 0 : i32
    return %arg0, %c0_i32 : i32, i32
  }
  func.func @transform_5(%arg0: i32) -> (i32, i32) {
    %c0_i32 = arith.constant 0 : i32
    %c0_i32_0 = arith.constant 0 : i32
    return %arg0, %c0_i32 : i32, i32
  }
}

</mosaic_0001>

<bundles_post_ra>
// kernel: tpu_custom_call.1
= control target key start
LH: loop header
LB: loop body
LE: loop exit
PB: predicated region body
PF: predicated region fallthrough
CT: control target
= control target key end

     0   :  { %10 = vsyncpa [#allocation3], 0  ;;  %s2732_s0 = inlined_call_operand.vmem [shape: s32[48,1], index: 0, kind: input, shape index: {}]   ;;  %s2733_s1 = inlined_call_operand.vmem [shape: f32[48,32], index: 1, kind: input, shape index: {}]   ;;  %s2734_s2 = inlined_call_operand.vmem [shape: f32[32,256], index: 2, kind: input, shape index: {}]   ;;  %s2735_s3 = inlined_call_operand.vmem [shape: f32[3,8,256], index: 3, kind: input, shape index: {}]   ;;  %s2736_s4 = inlined_call_operand.vmem [shape: f32[48,1], index: 4, kind: input, shape index: {}]   ;;  %s2737_s5 = inlined_call_operand.hbm [shape: f32[48,256], index: 5, kind: output, shape index: {}]  }
   0x1   :  { %12 = vsyncpa [#allocation3 + $0x1], 0  ;;  %s2393_s18 = smov 0   ;;  %s2395_s19 = smov 0  }
   0x2   :  { %s2397_s20 = smov 0   ;;  %s2399_s21 = smov 0  }
   0x3 LB: > { %s2414_s22 = sadd.s32 4294967295, %s2356_s21   ;;  %s2116_s23 = sadd.s32 4294967294, %s2356_s21   ;;  %s2356_s21 = sphi %s2399_s21, %s2743_s21   ;;  %s2352_s20 = sphi %s2397_s20, %s2742_s20   ;;  %s2348_s19 = sphi %s2395_s19, %s2741_s19   ;;  %s2344_s18 = sphi %s2393_s18, %s2740_s18  }
   0x4   : > { %s2418_s24 = sadd.s32 1, %s2356_s21   ;;  %s145_s25 = sadd.s32 1, %s2352_s20 }
   0x5   : > { %s142_s26 = ssub.s32 %s2356_s21, %s2418_s24  ;;  %p155_p0 = scmp.ne.s32.totalorder %s2352_s20, %s2348_s19 }
   0x6   : > { %p143_p1 = scmp.eq.s32.totalorder %s142_s26, 0  ;;  %p156_p2 = scmp.eq.s32.totalorder %s2414_s22, 2 }
   0x7   : > { %p161_p3 = scmp.ne.s32.totalorder %s2348_s19, %s2344_s18  ;;  %p162_p4 = scmp.eq.s32.totalorder %s2116_s23, 2 }
   0x8   : > { %s2429_s27 = scalar_select %p143_p1, %s2352_s20, %s145_s25  }
   0x9   : > { %p2431_p5 = por %p156_p2, %p155_p0  ;;  %p2435_p6 = por %p162_p4, %p161_p3 }
   0xa   : > { %p2119_p7 = scmp.ge.s32.totalorder %s2356_s21, 1  ;;  %p213_p8 = scmp.lt.s32.totalorder %s2356_s21, 4 }
   0xc   : > { %p214_p9 = pnand %p2119_p7, %p213_p8 }
   0xd   : > { %s2121_s30 = sshll.u32 (!%p214_p9), %s2414_s22, 1  ;;  %v289_v0 = vld [vmem:[%s2734_s2 + $0x8] sm:$0xff] (!%p214_p9)  ;;  %v291_v1 = vld [vmem:[%s2734_s2 + $0x18] sm:$0xff] (!%p214_p9)  ;;  %v288_v2 = vld [vmem:[%s2734_s2] sm:$0xff] (!%p214_p9)  ;;  %v2358_v3 = vmov (!%p214_p9), 0   ;;  %v2359_v8 = vmov (!%p214_p9), 0.0   ;;  %v272_v27 = vlaneseq (!%p214_p9) }
   0xe   : > { %217 = sbr.rel (%p214_p9) target bundleno = 784 (0x310), region = 40  ;;  %2272 = vset.pattern.permute.xlu0 (!%p214_p9), %v2358_v3  ;;  %p252_p10 = scmp.lt.s32.totalorder (!%p214_p9), %s2121_s30, 5  ;;  %v2161_v4 = vpack.c.bf16 (!%p214_p9), %v291_v1, %v289_v0  ;;  %v290_v5 = vld [vmem:[%s2734_s2 + $0x10] sm:$0xff] (!%p214_p9)  ;;  %v293_v6 = vld [vmem:[%s2734_s2 + $0x28] sm:$0xff] (!%p214_p9)  ;;  %v295_v7 = vld [vmem:[%s2734_s2 + $0x38] sm:$0xff] (!%p214_p9)  ;;  %367 = vmatprep.mubr.f32.mxu0 (!%p214_p9), %v2359_v8  ;;  %vm296_vm0 = vcmask (!%p214_p9), 261120  }
   0xf   : > { %v2163_v9 = vpack.c.bf16 (!%p214_p9), %v290_v5, %v288_v2  ;;  %v2165_v10 = vpack.c.bf16 (!%p214_p9), %v295_v7, %v293_v6  ;;  %v292_v11 = vld [vmem:[%s2734_s2 + $0x20] sm:$0xff] (!%p214_p9)  ;;  %v294_v12 = vld [vmem:[%s2734_s2 + $0x30] sm:$0xff] (!%p214_p9)  ;;  %635 = vmatprep.mubr.f32.mxu1 (!%p214_p9), %v2359_v8  ;;  %2273 = vset.pattern.permute.xlu1 (!%p214_p9), %v2358_v3  ;;  %v381_v14 = vld [vmem:[%s2735_s3 + $0x8] sm:$0xff] (!%p214_p9)  ;;  %v273_v28 = vand.u32 (!%p214_p9), 127, %v272_v27  ;;  %vm382_vm1 = vcmask (!%p214_p9), 64512   ;;  %s2160_s15 = sshll.u32 (!%p214_p9), %s2414_s22, 9 }
  0x10   : > { %2162 = vmatprep.subr.bf16.mxu0 (!%p214_p9), %v2161_v4  ;;  %v2167_v13 = vpack.c.bf16 (!%p214_p9), %v294_v12, %v292_v11  ;;  %v2477_v16 = vand.u32 (!%p214_p9), 4294901760, %v381_v14  ;;  %v380_v17 = vld [vmem:[%s2735_s3] sm:$0xff] (!%p214_p9)  ;;  %v2138_v29 = vld [vmem:[%s2735_s3 + $0x18] sm:$0xff] (!%p214_p9)  ;;  %v2137_v40 = vld [vmem:[%s2735_s3 + $0x10] sm:$0xff] (!%p214_p9)  ;;  %s2684_s25 = scalar_lea.hbm (!%p214_p9), %s2737_s5, %s2160_s15  ;;  %s2360_s6 = smov (!%p214_p9), [#allocation2]  }
  0x11   : > { %2164 = vmatpush1.bf16.msra.mxu0 (!%p214_p9), %v2163_v9  ;;  %v2486_v18 = vand.u32 (!%p214_p9), 4294901760, %v380_v17  ;;  %v2501_v33 = vand.u32 (!%p214_p9), 4294901760, %v2138_v29  ;;  %v2528_v46 = vand.u32 (!%p214_p9), 4294901760, %v2137_v40  ;;  %v2146_v47 = vld [vmem:[%s2735_s3 + $0x28] sm:$0xff] (!%p214_p9)  ;;  %v2145_v56 = vld [vmem:[%s2735_s3 + $0x20] sm:$0xff] (!%p214_p9)  ;;  %s2298_s8 = sshll.u32 (!%p214_p9), %s2360_s6, 4  ;;  %s2299_s8 = int_to_ptr.vmem [resolvable:$false] %s2298_s8 }
  0x12   : > { %2166 = vmatprep.subr.bf16.mxu0 (!%p214_p9), %v2165_v10  ;;  %v479_v21 = vsub.f32 (!%p214_p9), %v381_v14, %v2477_v16  ;;  %v2541_v52 = vand.u32 (!%p214_p9), 4294901760, %v2146_v47  ;;  %v2564_v60 = vand.u32 (!%p214_p9), 4294901760, %v2145_v56  ;;  %s2300_s9 = scalar_lea.vmem (!%p214_p9), %s2299_s8, 1024 }
  0x13   : > { %v485_v22 = vsub.f32 (!%p214_p9), %v380_v17, %v2486_v18  ;;  %v2518_v41 = vsub.f32 (!%p214_p9), %v2138_v29, %v2501_v33  ;;  %v2545_v53 = vsub.f32 (!%p214_p9), %v2137_v40, %v2528_v46 }
  0x14   : > { %569 = vmatprep.subr.mxu1 (!%p214_p9), %v479_v21  ;;  %v480_v24 = vand.u32 (!%p214_p9), 4294901760, %v479_v21  ;;  %v2558_v57 = vsub.f32 (!%p214_p9), %v2146_v47, %v2541_v52  ;;  %v2577_v63 = vsub.f32 (!%p214_p9), %v2145_v56, %v2564_v60 }
  0x15   : > { %s2745_s30 = smov (!%p252_p10, %s2121_s30), 5  ;;  %2168 = vmatpush1.bf16.msra.mxu0 %v2167_v13  ;;  %572 = vmatpush1.msra.mxu1 %v485_v22  ;;  %v486_v31 = vand.u32 4294901760, %v485_v22  ;;  %v1001_v50 = vand.u32 4294901760, %v2518_v41  ;;  %v1007_v58 = vand.u32 4294901760, %v2545_v53 }
  0x16   : > { %s2468_s7 = sshll.u32 %s2745_s30, 3  ;;  %390 = vmatprep.subr.mxu0 %v2477_v16  ;;  %653 = vmatprep.subr.mxu1 %v2477_v16  ;;  %v481_v25 = vsub.f32 %v479_v21, %v480_v24  ;;  %v1584_v61 = vand.u32 4294901760, %v2558_v57  ;;  %v1590_v2 = vand.u32 4294901760, %v2577_v63 }
  0x17   : > { %s255_s10 = scalar_lea.vmem %s2732_s0, %s2468_s7  ;;  %s261_s16 = scalar_lea.vmem %s2733_s1, %s2468_s7  ;;  %v487_v37 = vsub.f32 %v485_v22, %v486_v31  ;;  %v1002_v55 = vsub.f32 %v2518_v41, %v1001_v50  ;;  %v1008_v62 = vsub.f32 %v2545_v53, %v1007_v58 }
  0x18   : > { %v270_v15 = vld [vmem:[%s255_s10] sm:$0xff]  ;;  %v271_v19 = vld [vmem:[%s255_s10 + $0x8] sm:$0xff]  ;;  %v482_v26 = vand.u32 4294901760, %v481_v25  ;;  %v1585_v0 = vsub.f32 %v2558_v57, %v1584_v61  ;;  %v1591_v4 = vsub.f32 %v2577_v63, %v1590_v2  ;;  %s267_s13 = scalar_lea.vmem %s2736_s4, %s2468_s7  ;;  %s248_s7 = sand.u32 1, %s2348_s19  }
  0x19   : > { %275 = vperm.xlu0 %2272, %v270_v15   ;;  %v286_v20 = vld [vmem:[%s261_s16] sm:$0xff]  ;;  %v287_v23 = vld [vmem:[%s261_s16 + $0x8] sm:$0xff]  ;;  %v488_v45 = vand.u32 4294901760, %v487_v37  ;;  %v1003_v59 = vand.u32 4294901760, %v1002_v55  ;;  %v1009_v1 = vand.u32 4294901760, %v1008_v62  ;;  %s2120_s14 = sshll.u32 %s248_s7, 5 }
  0x1a   : > { %2129 = vmatmul.mubr.msk.f32.vlgmr.msra.gmra.mrb[0].mxu0 %vm296_vm0, %v286_v20  ;;  %v1586_v3 = vand.u32 4294901760, %v1585_v0  ;;  %v1592_v5 = vand.u32 4294901760, %v1591_v4  ;;  %v1452_v40 = vld [vmem:[%s267_s13] sm:$0xff]  ;;  %s250_s30 = scalar_lea.vmem [#allocation2], %s2120_s14  ;;  %s2691_s22 = scalar_lea.sflag [#allocation3], %s248_s7 }
  0x1b   : > { %392 = vmatpush1.msra.mxu0 %v2486_v18  ;;  %373 = vmatprep.mubr.f32.mxu0 %v2359_v8  ;;  %s2030_s16 = sshll.u32 %s250_s30, 4  ;;  %s2686_s16 = int_to_ptr.vmem [resolvable:$true] %s2030_s16 }
  0x1c   : > { %483 = vmatprep.subr.mxu0 %v482_v26  ;;  %s2294_s26 = scalar_lea.vmem %s2686_s16, 512  ;;  %p2301_p0 = scmp.lt.s32.totalorder %s2686_s16, %s2299_s8 }
  0x1d   : > { %278 = vperm.xlu0 %2272, %v271_v19   ;;  %p2295_p11 = scmp.ne.s32.totalorder %s2686_s16, %s2294_s26  ;;  %p2302_p1 = scmp.lt.s32.totalorder %s2300_s9, %s2294_s26 }
  0x1e   : > { %2130 = vmatmul.mubr.msk.f32.gmra.mrb[2].mxu0 %vm296_vm0, %v287_v23 }
  0x1f   : > { %455 = vmatprep.mubr.f32.mxu0 %v2359_v8  ;;  %p2296_p12 = pnand %p2295_p11, %p2431_p5  ;;  %p2303_p2 = por %p2302_p1, %p2301_p0 }
  0x21   : > { %p2297_p13 = pneg %p2296_p12 }
  0x23   : > { %p2304_p3 = pnand %p2303_p2, %p2297_p13 }
  0x98   : > { %v276_v30 = vpop.permute.xlu0 %275 }
  0x99   : > { %vm280_vm2 = vcmp.eq.s32.totalorder %v273_v28, %v276_v30 }
  0x9a   : > { %v2499_v32 = vsel %vm280_vm2, 1.0, %v2359_v8 }
  0x9b   : > { %v384_v34 = vsel %vm382_vm1, %v2499_v32, 0 }
  0x9c   : > { %v279_v35 = vpop.permute.xlu0 %278  ;;  %v2505_v36 = vsub.f32 %v384_v34, %v384_v34 }
  0x9d   : > { %vm281_vm3 = vcmp.eq.s32.totalorder %v273_v28, %v279_v35 }
  0x9e   : > { %v2508_v38 = vsel %vm281_vm3, 1.0, %v2359_v8  ;;  %638 = vmatmul.mubr.f32.vlgmr.msra.gmra.mrb[0].mxu1 %v2505_v36  ;;  %v2512_v39 = vand.u32 4294901760, %v2505_v36 }
  0x9f   : > { %643 = vmatprep.mubr.f32.mxu1 %v2359_v8  ;;  %v387_v42 = vsel %vm382_vm1, %v2508_v38, 0  ;;  %655 = vmatpush1.msra.mxu1 %v2486_v18 }
  0xa0   : > { %v2524_v43 = vsub.f32 %v387_v42, %v387_v42  ;;  %v459_v44 = vsub.f32 %v2505_v36, %v2512_v39  ;;  %740 = vmatprep.subr.mxu1 %v480_v24 }
  0xa2   : > { %646 = vmatmul.mubr.f32.gmra.mrb[2].mxu1 %v2524_v43  ;;  %v460_v48 = vand.u32 4294901760, %v459_v44  ;;  %v2535_v49 = vand.u32 4294901760, %v2524_v43 }
  0xa3   : > { %718 = vmatprep.mubr.f32.mxu1 %v2359_v8 }
  0xa4   : > { %461 = vmatmul.mubr.f32.vlgmr.msra.gmra.mrb[4].mxu0 %v460_v48  ;;  %v470_v51 = vsub.f32 %v2524_v43, %v2535_v49 }
  0xa5   : > { %489 = vmatpush1.msra.mxu0 %v488_v45  ;;  %466 = vmatprep.mubr.f32.mxu0 %v2359_v8 }
  0xa6   : > { %722 = vmatmul.mubr.f32.vlgmr.msra.gmra.mrb[0].mxu1 %v2512_v39  ;;  %v471_v54 = vand.u32 4294901760, %v470_v51  ;;  %911 = vmatprep.subr.mxu0 %v2501_v33 }
  0xa7   : > { %727 = vmatprep.mubr.f32.mxu1 %v2359_v8  ;;  %744 = vmatpush1.msra.mxu1 %v486_v31 }
  0xa8   : > { %472 = vmatmul.mubr.f32.gmra.mrb[6].mxu0 %v471_v54  ;;  %823 = vmatprep.subr.mxu1 %v2477_v16 }
  0xa9   : > { %552 = vmatprep.mubr.f32.mxu0 %v2359_v8 }
  0xaa   : > { %731 = vmatmul.mubr.f32.gmra.mrb[2].mxu1 %v2535_v49 }
  0xab   : > { %807 = vmatprep.mubr.f32.mxu1 %v2359_v8 }
  0xac   : > { %2131 = vmatmul.mubr.msk.f32.vlgmr.msra.gmra.mrb[4].mxu0 %vm382_vm1, %v2499_v32 }
  0xad   : > { %913 = vmatpush1.msra.mxu0 %v2528_v46  ;;  %559 = vmatprep.mubr.f32.mxu0 %v2359_v8 }
  0xae   : > { %2133 = vmatmul.mubr.msk.f32.vlgmr.msra.gmra.mrb[0].mxu1 %vm382_vm1, %v2499_v32  ;;  %1004 = vmatprep.subr.mxu0 %v1003_v59 }
  0xaf   : > { %814 = vmatprep.mubr.f32.mxu1 %v2359_v8  ;;  %825 = vmatpush1.msra.mxu1 %v2486_v18 }
  0xb0   : > { %2132 = vmatmul.mubr.msk.f32.gmra.mrb[6].mxu0 %vm382_vm1, %v2508_v38  ;;  %1494 = vmatprep.subr.mxu1 %v2541_v52 }
  0xb1   : > { %976 = vmatprep.mubr.f32.mxu0 %v2359_v8 }
  0xb2   : > { %2134 = vmatmul.mubr.msk.f32.gmra.mrb[2].mxu1 %vm382_vm1, %v2508_v38 }
  0xb3   : > { %888 = vmatprep.mubr.f32.mxu1 %v2359_v8 }
  0xb4   : > { %982 = vmatmul.mubr.f32.vlgmr.msra.gmra.mrb[8].mxu0 %v460_v48 }
  0xb5   : > { %1010 = vmatpush1.msra.mxu0 %v1009_v1  ;;  %987 = vmatprep.mubr.f32.mxu0 %v2359_v8 }
  0xb6   : > { %2135 = vmatmul.mubr.msk.f32.vlgmr.msra.gmra.mrb[0].mxu1 %vm382_vm1, %v2499_v32  ;;  %1090 = vmatprep.subr.mxu0 %v2518_v41 }
  0xb7   : > { %895 = vmatprep.mubr.f32.mxu1 %v2359_v8  ;;  %1496 = vmatpush1.msra.mxu1 %v2564_v60 }
  0xb8   : > { %993 = vmatmul.mubr.f32.gmra.mrb[10].mxu0 %v471_v54  ;;  %1587 = vmatprep.subr.mxu1 %v1586_v3 }
  0xb9   : > { %1073 = vmatprep.mubr.f32.mxu0 %v2359_v8 }
  0xba   : > { %2136 = vmatmul.mubr.msk.f32.gmra.mrb[2].mxu1 %vm382_vm1, %v2508_v38 }
  0xbb   : > { %1559 = vmatprep.mubr.f32.mxu1 %v2359_v8 }
  0xbc   : > { %2139 = vmatmul.mubr.msk.f32.vlgmr.msra.gmra.mrb[8].mxu0 %vm382_vm1, %v2499_v32 }
  0xbd   : > { %1093 = vmatpush1.msra.mxu0 %v2545_v53  ;;  %1080 = vmatprep.mubr.f32.mxu0 %v2359_v8 }
  0xbe   : > { %1565 = vmatmul.mubr.f32.vlgmr.msra.gmra.mrb[4].mxu1 %v460_v48  ;;  %1174 = vmatprep.subr.mxu0 %v2501_v33 }
  0xbf   : > { %1570 = vmatprep.mubr.f32.mxu1 %v2359_v8  ;;  %1593 = vmatpush1.msra.mxu1 %v1592_v5 }
  0xc0   : > { %2140 = vmatmul.mubr.msk.f32.gmra.mrb[10].mxu0 %vm382_vm1, %v2508_v38  ;;  %1673 = vmatprep.subr.mxu1 %v2558_v57  ;;  %v1453_v57 = vld [vmem:[%s267_s13 + $0x8] sm:$0xff] }
  0xc1   : > { %1156 = vmatprep.mubr.f32.mxu0 %v2359_v8 }
  0xc2   : > { %1576 = vmatmul.mubr.f32.gmra.mrb[6].mxu1 %v471_v54 }
  0xc3   : > { %1656 = vmatprep.mubr.f32.mxu1 %v2359_v8 }
  0xc4   : > { %1159 = vmatmul.mubr.f32.vlgmr.msra.gmra.mrb[8].mxu0 %v2505_v36 }
  0xc5   : > { %1176 = vmatpush1.msra.mxu0 %v2528_v46  ;;  %1164 = vmatprep.mubr.f32.mxu0 %v2359_v8 }
  0xc6   : > { %2147 = vmatmul.mubr.msk.f32.vlgmr.msra.gmra.mrb[4].mxu1 %vm382_vm1, %v2499_v32  ;;  %1261 = vmatprep.subr.mxu0 %v1001_v50 }
  0xc7   : > { %1663 = vmatprep.mubr.f32.mxu1 %v2359_v8  ;;  %1676 = vmatpush1.msra.mxu1 %v2577_v63 }
  0xc8   : > { %1167 = vmatmul.mubr.f32.gmra.mrb[10].mxu0 %v2524_v43  ;;  %1757 = vmatprep.subr.mxu1 %v2541_v52 }
  0xc9   : > { %1239 = vmatprep.mubr.f32.mxu0 %v2359_v8 }
  0xca   : > { %2148 = vmatmul.mubr.msk.f32.gmra.mrb[6].mxu1 %vm382_vm1, %v2508_v38 }
  0xcb   : > { %1739 = vmatprep.mubr.f32.mxu1 %v2359_v8 }
  0xcc   : > { %1243 = vmatmul.mubr.f32.vlgmr.msra.gmra.mrb[8].mxu0 %v2512_v39 }
  0xcd   : > { %1265 = vmatpush1.msra.mxu0 %v1007_v58  ;;  %1248 = vmatprep.mubr.f32.mxu0 %v2359_v8 }
  0xce   : > { %1742 = vmatmul.mubr.f32.vlgmr.msra.gmra.mrb[4].mxu1 %v2505_v36  ;;  %1344 = vmatprep.subr.mxu0 %v2501_v33 }
  0xcf   : > { %1747 = vmatprep.mubr.f32.mxu1 %v2359_v8  ;;  %1759 = vmatpush1.msra.mxu1 %v2564_v60 }
  0xd0   : > { %1252 = vmatmul.mubr.f32.gmra.mrb[10].mxu0 %v2535_v49  ;;  %1844 = vmatprep.subr.mxu1 %v1584_v61 }
  0xd1   : > { %1328 = vmatprep.mubr.f32.mxu0 %v2359_v8 }
  0xd2   : > { %1750 = vmatmul.mubr.f32.gmra.mrb[6].mxu1 %v2524_v43 }
  0xd3   : > { %1822 = vmatprep.mubr.f32.mxu1 %v2359_v8 }
  0xd4   : > { %2141 = vmatmul.mubr.msk.f32.vlgmr.msra.gmra.mrb[8].mxu0 %vm382_vm1, %v2499_v32 }
  0xd5   : > { %1346 = vmatpush1.msra.mxu0 %v2528_v46  ;;  %1335 = vmatprep.mubr.f32.mxu0 %v2359_v8 }
  0xd6   : > { %1826 = vmatmul.mubr.f32.vlgmr.msra.gmra.mrb[4].mxu1 %v2512_v39 }
  0xd7   : > { %1831 = vmatprep.mubr.f32.mxu1 %v2359_v8  ;;  %1848 = vmatpush1.msra.mxu1 %v1590_v2 }
  0xd8   : > { %2142 = vmatmul.mubr.msk.f32.gmra.mrb[10].mxu0 %vm382_vm1, %v2508_v38  ;;  %1927 = vmatprep.subr.mxu1 %v2541_v52 }
  0xd9   : > { %1409 = vmatprep.mubr.f32.mxu0 %v2359_v8 }
  0xda   : > { %1835 = vmatmul.mubr.f32.gmra.mrb[6].mxu1 %v2535_v49 }
  0xdb   : > { %1911 = vmatprep.mubr.f32.mxu1 %v2359_v8 }
  0xdc   : > { %2143 = vmatmul.mubr.msk.f32.vlgmr.msra.gmra.mrb[8].mxu0 %vm382_vm1, %v2499_v32 }
  0xdd   : > { %1416 = vmatprep.mubr.f32.mxu0 %v2359_v8 }
  0xde   : > { %2149 = vmatmul.mubr.msk.f32.vlgmr.msra.gmra.mrb[4].mxu1 %vm382_vm1, %v2499_v32 }
  0xdf   : > { %1918 = vmatprep.mubr.f32.mxu1 %v2359_v8  ;;  %1929 = vmatpush1.msra.mxu1 %v2564_v60 }
  0xe0   : > { %2144 = vmatmul.mubr.msk.f32.gmra.mrb[10].mxu0 %vm382_vm1, %v2508_v38 }
  0xe2   : > { %2150 = vmatmul.mubr.msk.f32.gmra.mrb[6].mxu1 %vm382_vm1, %v2508_v38 }
  0xe3   : > { %1992 = vmatprep.mubr.f32.mxu1 %v2359_v8 }
  0xe6   : > { %2151 = vmatmul.mubr.msk.f32.vlgmr.msra.gmra.mrb[4].mxu1 %vm382_vm1, %v2499_v32 }
  0xe7   : > { %1999 = vmatprep.mubr.f32.mxu1 %v2359_v8 }
  0xea   : > { %2152 = vmatmul.mubr.msk.f32.gmra.mrb[6].mxu1 %vm382_vm1, %v2508_v38 }
  0xed   : > { %v369_v6 = vpop.f32.mrb[0].mxu0 }
  0xee   : > { %v371_v7 = vpop.f32.mrb[1].mxu0 }
  0xf1   : > { %v375_v9 = vpop.f32.mrb[2].mxu0 }
  0xf2   : > { %v377_v10 = vpop.f32.mrb[3].mxu0 }
 0x17f   : > { %v555_v11 = vpop.f32.mrb[4].mxu0 }
 0x180   : > { %v557_v12 = vpop.f32.mrb[5].mxu0 }
 0x183   : > { %v562_v13 = vpop.f32.mrb[6].mxu0 }
 0x184   : > { %v564_v14 = vpop.f32.mrb[7].mxu0 }
 0x189   : > { %v891_v15 = vpop.f32.mrb[0].mxu1 }
 0x18a   : > { %v2169_v16 = vadd.f32 %v891_v15, %v555_v11  ;;  %v893_v17 = vpop.f32.mrb[1].mxu1 }
 0x18b   : > { %v2170_v18 = vadd.f32 %v893_v17, %v557_v12 }
 0x18c   : > { %v903_v19 = vmul.f32 %v2169_v16, %v369_v6 }
 0x18d   : > { %v898_v20 = vpop.f32.mrb[2].mxu1  ;;  %v904_v21 = vmul.f32 %v2170_v18, %v371_v7 }
 0x18e   : > { %v2171_v22 = vadd.f32 %v898_v20, %v562_v13  ;;  %v900_v8 = vpop.f32.mrb[3].mxu1 }
 0x18f   : > { %v2172_v23 = vadd.f32 %v900_v8, %v564_v14 }
 0x190   : > { %v905_v24 = vmul.f32 %v2171_v22, %v375_v9 }
 0x191   : > { %v906_v25 = vmul.f32 %v2172_v23, %v377_v10 }
 0x1af   : > { %v1412_v26 = vpop.f32.mrb[8].mxu0 }
 0x1b0   : > { %v1424_v27 = vadd.f32 %v1412_v26, %v903_v19  ;;  %v1414_v28 = vpop.f32.mrb[9].mxu0 }
 0x1b1   : > { %v1425_v29 = vadd.f32 %v1414_v28, %v904_v21 }
 0x1b3   : > { %v1419_v30 = vpop.f32.mrb[10].mxu0  ;;  %v1428_v31 = vmax.f32 %v1424_v27, %v1425_v29 }
 0x1b4   : > { %v1426_v32 = vadd.f32 %v1419_v30, %v905_v24  ;;  %v1421_v33 = vpop.f32.mrb[11].mxu0 }
 0x1b5   : > { %v1427_v34 = vadd.f32 %v1421_v33, %v906_v25  ;;  %1429 = vmax.xlane.f32.xlu1 %v1428_v31 }
 0x1b7   : > { %v1431_v35 = vmax.f32 %v1426_v32, %v1427_v34 }
 0x1b9   : > { %v1995_v36 = vpop.f32.mrb[4].mxu1  ;;  %1432 = vmax.xlane.f32.xlu1 %v1431_v35 }
 0x1ba   : > { %v1997_v37 = vpop.f32.mrb[5].mxu1 }
 0x1bd   : > { %v2668_v38 = vpop.f32.mrb[6].mxu1 }
 0x1be   : > { %v2670_v39 = vpop.f32.mrb[7].mxu1 }
 0x1ca   : > { %1456 = vperm.xlu1 %2273, %v1452_v40  }
 0x242   : > { %v1430_v41 = vpop.xlane.xlu1 %1429 }
 0x243   : > { %v1434_v42 = vsub.f32 %v1424_v27, %v1430_v41  ;;  %v1435_v43 = vsub.f32 %v1425_v29, %v1430_v41 }
 0x245   : > { %v1438_v44 = vmul.f32 1.442695, %v1434_v42  ;;  %v1440_v45 = vmul.f32 1.442695, %v1435_v43 }
 0x246   : > { %v1433_v46 = vpop.xlane.xlu1 %1432 }
 0x247   : > { %2274 = vpow2.f32 %v1438_v44  ;;  %v1436_v47 = vsub.f32 %v1426_v32, %v1433_v46  ;;  %v1437_v48 = vsub.f32 %v1427_v34, %v1433_v46 }
 0x248   : > { %2276 = vpow2.f32 %v1440_v45 }
 0x249   : > { %v1442_v49 = vmul.f32 1.442695, %v1436_v47  ;;  %v1444_v50 = vmul.f32 1.442695, %v1437_v48 }
 0x24a   : > { %v1457_v58 = vpop.permute.xlu1 %1456 }
 0x24b   : > { %2278 = vpow2.f32 %v1442_v49 }
 0x24c   : > { %2280 = vpow2.f32 %v1444_v50 }
 0x251   : > { %v2275_v51 = vpop.eup %2274 }
 0x252   : > { %v2277_v52 = vpop.eup %2276  ;;  %v1464_v60 = vmul.f32 %v2275_v51, %v1457_v58 }
 0x253   : > { %v1446_v53 = vadd.f32 %v2277_v52, %v2275_v51  ;;  %v1465_v61 = vmul.f32 %v2277_v52, %v1457_v58 }
 0x255   : > { %v2279_v54 = vpop.eup %2278  ;;  %1447 = vadd.xlane.f32.xlu0 %v1446_v53 }
 0x256   : > { %v2281_v55 = vpop.eup %2280 }
 0x257   : > { %v1449_v56 = vadd.f32 %v2281_v55, %v2279_v54 }
 0x259   : > { %1450 = vadd.xlane.f32.xlu1 %v1449_v56 }
 0x26a   : > { %1461 = vperm.xlu1 %2273, %v1453_v57  }
 0x2e2   : > { %v1448_v59 = vpop.xlane.xlu0 %1447 }
 0x2e3   : > { %v1468_v62 = vmul.f32 1e-07, %v1448_v59  ;;  %2282 = vlog2.f32 %v1448_v59 }
 0x2e5   : > { %v1470_v63 = vadd.f32 %v1468_v62, %v1464_v60  ;;  %v1471_v0 = vadd.f32 %v1468_v62, %v1465_v61 }
 0x2e6   : > { %v1451_v1 = vpop.xlane.xlu1 %1450 }
 0x2e7   : > { %2284 = vlog2.f32 %v1470_v63  ;;  %v1469_v3 = vmul.f32 1e-07, %v1451_v1 }
 0x2e8   : > { %2286 = vlog2.f32 %v1471_v0 }
 0x2e9   : > { %2288 = vlog2.f32 %v1451_v1 }
 0x2ea   : > { %v1462_v2 = vpop.permute.xlu1 %1461 }
 0x2eb   : > { %v1466_v4 = vmul.f32 %v2279_v54, %v1462_v2  ;;  %v1467_v5 = vmul.f32 %v2281_v55, %v1462_v2 }
 0x2ed   : > { %v1472_v6 = vadd.f32 %v1469_v3, %v1466_v4  ;;  %v1473_v7 = vadd.f32 %v1469_v3, %v1467_v5  ;;  %v2283_v9 = vpop.eup %2282 }
 0x2ee   : > { %v1483_v13 = vmul.f32 0.6931472, %v2283_v9 }
 0x2ef   : > { %2290 = vlog2.f32 %v1472_v6 }
 0x2f0   : > { %2292 = vlog2.f32 %v1473_v7 }
 0x2f1   : > { %v2285_v10 = vpop.eup %2284 }
 0x2f2   : > { %v2287_v11 = vpop.eup %2286  ;;  %v1475_v12 = vmul.f32 0.6931472, %v2285_v10 }
 0x2f3   : > { %v1477_v14 = vmul.f32 0.6931472, %v2287_v11  ;;  %v2289_v18 = vpop.eup %2288 }
 0x2f4   : > { %v1486_v15 = vsub.f32 %v1475_v12, %v1483_v13  ;;  %v1485_v22 = vmul.f32 0.6931472, %v2289_v18 }
 0x2f5   : > { %v1487_v16 = vsub.f32 %v1477_v14, %v1483_v13 }
 0x2f6   : > { %v2007_v17 = vsub.f32 %v1486_v15, %v1995_v36 }
 0x2f7   : > { %v2008_v19 = vsub.f32 %v1487_v16, %v1997_v37 }
 0x2f8   : > { %2011 = vst [vmem:[%s250_s30] sm:$0xff] %v2007_v17 }
 0x2f9   : > { %v2291_v20 = vpop.eup %2290  ;;  %2012 = vst [vmem:[%s250_s30 + $0x8] sm:$0xff] %v2008_v19 }
 0x2fa   : > { %v2293_v21 = vpop.eup %2292  ;;  %v1479_v8 = vmul.f32 0.6931472, %v2291_v20 }
 0x2fb   : > { %v1481_v23 = vmul.f32 0.6931472, %v2293_v21 }
 0x2fc   : > { %v1488_v24 = vsub.f32 %v1479_v8, %v1485_v22 }
 0x2fd   : > { %v1489_v25 = vsub.f32 %v1481_v23, %v1485_v22 }
 0x2fe   : > { %v2009_v26 = vsub.f32 %v1488_v24, %v2668_v38 }
 0x2ff   : > { %v2010_v27 = vsub.f32 %v1489_v25, %v2670_v39 }
 0x300   : > { %2013 = vst [vmem:[%s250_s30 + $0x10] sm:$0xff] %v2009_v26 }
 0x301   : > { %2014 = vst [vmem:[%s250_s30 + $0x18] sm:$0xff] %v2010_v27 }
 0x302   : > { %2307 = shalt.err (!%p2304_p3)
}
 0x303   : > { %s2308_s10 = scalar_lea.hbm %s2684_s25, 512  ;;  %s2312_s13 = scalar_lea.hbm %s2737_s5, 1536 }
 0x304   : > { %p2309_p4 = scmp.ne.s32.totalorder %s2684_s25, %s2308_s10  ;;  %p2313_p9 = scmp.lt.u32.totalorder %s2684_s25, %s2737_s5 }
 0x305   : > { %p2314_p10 = scmp.lt.u32.totalorder %s2312_s13, %s2308_s10  ;;  %p2316_p12 = scmp.lt.u32.totalorder %s2308_s10, %s2684_s25 }
 0x306   : > { %p2310_p7 = pnand %p2309_p4, %p2431_p5 }
 0x307   : > { %p2315_p11 = por %p2314_p10, %p2313_p9 }
 0x308   : > { %p2311_p8 = pneg %p2310_p7 }
 0x309   : > { %p2317_p13 = por %p2316_p12, %p2315_p11 }
 0x30b   : > { %p2318_p0 = pnand %p2317_p13, %p2311_p8 }
 0x30d   : > { %2321 = shalt.err (!%p2318_p0)
}
 0x30e   : > { %s2361_s30 = smov 256   ;;  %s2362_s15 = smov 16  }
 0x30f   : > { %2229 = dma.vmem_to_hbm [thread:$0]  (%p2431_p5), %s2686_s16, 512, %s2684_s25, %s2691_s22, %s2361_s30, %s2361_s30, %s2362_s15  }
 0x310 PF: > { %p2235_p1 = scmp.ge.s32.totalorder %s2356_s21, 2  ;;  %s2045_s17 = sand.u32 1, %s2344_s18  }
 0x311   : > { %s2046_s23 = scalar_lea.sflag [#allocation3], %s2045_s17 }
 0x312   : > { %p2232_p2 = pnand %p2235_p1, %p2435_p6 }
 0x314   : > { %2339 = dma.done.wait (!%p2232_p2), %s2046_s23, 512  }
 0x315   : > { %2341 = vsyncadd (!%p2232_p2), %s2046_s23, 4294966784  ;;  %p15_p3 = scmp.ge.s32.totalorder %s2418_s24, 5   ;;  %s2740_s18 = smov %s2348_s19 }
 0x316   : > { %s2741_s19 = smov %s2352_s20  ;;  %s2742_s20 = smov %s2429_s27 }
 0x317   : > { %s2743_s21 = smov %s2418_s24  ;;  %17 = sbr.rel (!%p15_p3) target bundleno = 3 (0x3), region = 83 }
 0x31e   :  { %2051 = vsyncpa [#allocation3], 1 }
 0x31f   :  { %2053 = vsyncpa [#allocation3 + $0x1], 1 }

</bundles_post_ra>
